<compile_context>
chip_gen: v5e
topology: v5e:2x2
jax: 0.10.0
libtpu: 0.0.40
codegen_flags: <defaults>
</compile_context>

<pallas_src>
import functools

import jax
import jax.numpy as jnp
from jax.experimental import pallas as pl
from jax.experimental.pallas import tpu as pltpu


def _fc_kernel_fullk(x_ref, w_ref, b_ref, o_ref):
    """Full-K block: one MXU matmul, bias fused, cast to output dtype."""
    acc = jnp.dot(x_ref[...], w_ref[...], preferred_element_type=jnp.float32)
    o_ref[...] = (acc + b_ref[...].astype(jnp.float32)).astype(o_ref.dtype)


def _fc_kernel_ktiled(x_ref, w_ref, b_ref, o_ref, acc_ref):
    """K-streamed fallback: accumulate in f32 scratch, store once at the end."""
    k = pl.program_id(2)
    part = jnp.dot(x_ref[...], w_ref[...], preferred_element_type=jnp.float32)

    @pl.when(k == 0)
    def _():
        acc_ref[...] = part + b_ref[...].astype(jnp.float32)

    @pl.when(k != 0)
    def _():
        acc_ref[...] += part

    @pl.when(k == pl.num_programs(2) - 1)
    def _():
        o_ref[...] = acc_ref[...].astype(o_ref.dtype)


def _round_up(a, m):
    return (a + m - 1) // m * m


def _vmem_budget_bytes():
    """(tile-footprint budget, physical VMEM) — generation aware."""
    try:
        cap = int(pltpu.get_tpu_info().vmem_capacity_bytes)
    except Exception:
        cap = 64 * 1024 * 1024  # conservative (v7x-sized) fallback
    # ~48 MiB budget on v7x (64 MiB/TC), ~96-100 MiB on v5e/v6e (128 MiB).
    budget = min(cap * 3 // 4, 100 * 1024 * 1024)
    return budget, cap


@functools.partial(jax.jit, static_argnames=("tm", "tn", "tk"))
def fc_forward(x, w, b, *, tm=None, tn=None, tk=None):
    """out = x @ w + b   (w is (in, out), b is (1, out))."""
    M, K = x.shape
    Kw, N = w.shape
    assert K == Kw and b.shape == (1, N)
    assert K % 128 == 0 and N % 128 == 0, "feature dims must be lane aligned"

    out_dtype = x.dtype
    x_sz = x.dtype.itemsize
    w_sz = w.dtype.itemsize
    b_sz = b.dtype.itemsize
    o_sz = jnp.dtype(out_dtype).itemsize

    # Pad batch to a native sublane multiple (8 for 32-bit, 16 for 16-bit, ...).
    sub = 8 if x_sz >= 4 else (16 if x_sz == 2 else 32)
    Mp = max(sub, _round_up(M, sub))
    if Mp != M:
        x = jnp.pad(x, ((0, Mp - M), (0, 0)))

    budget, vmem_cap = _vmem_budget_bytes()

    # ---- Tile selection --------------------------------------------------
    if tm is None:
        tm = min(Mp, 256)
        # Always a sublane-aligned divisor of Mp (fixes Mp % tm hazard).
        while Mp % tm != 0:
            tm -= sub

    def fp(tn_, tk_, w_bufs=2):
        # Double-buffered x and output, `w_bufs` weight buffers, bias.
        return (2 * tm * tk_ * x_sz + w_bufs * tk_ * tn_ * w_sz
                + 2 * tm * tn_ * o_sz + 2 * tn_ * b_sz)

    if tn is None:
        if fp(N, K) <= budget:
            tn = N                      # collapse: single N block, full K
        elif fp(N, min(K, 512), w_bufs=3) <= budget:
            tn = N                      # full-width output, K streamed
        elif N % 256 == 0 and fp(256, min(K, 512), w_bufs=3) <= budget:
            tn = 256
        else:
            tn = 128
        tn = min(tn, N)

    if tk is None:
        if fp(tn, K) <= budget:
            tk = K
        else:
            tk = 128
            for cand in (512, 256):
                if K % cand == 0 and fp(tn, cand, w_bufs=3) <= budget:
                    tk = cand
                    break

    assert Mp % tm == 0 and N % tn == 0 and K % tk == 0
    gm, gn, gk = Mp // tm, N // tn, K // tk

    vmem_limit = int(min(vmem_cap, budget + (8 << 20)))

    cost = pl.CostEstimate(
        flops=2 * Mp * N * K,
        transcendentals=0,
        bytes_accessed=Mp * K * x_sz + K * N * w_sz + N * b_sz + Mp * N * o_sz,
    )

    if gk == 1:
        # Collapsed / full-K path.  Grid is (gn, gm): M is innermost, so the
        # weight tile (indexed only by j) is DMA'd once per N block even for
        # large batches.  For the default size this is a single grid step.
        out = pl.pallas_call(
            _fc_kernel_fullk,
            out_shape=jax.ShapeDtypeStruct((Mp, N), out_dtype),
            grid_spec=pltpu.PrefetchScalarGridSpec(
                num_scalar_prefetch=0,
                grid=(gn, gm),
                in_specs=[
                    pl.BlockSpec((tm, K), lambda j, i: (i, 0)),   # x tile
                    pl.BlockSpec((K, tn), lambda j, i: (0, j)),   # w tile
                    pl.BlockSpec((1, tn), lambda j, i: (0, j)),   # bias tile
                ],
                out_specs=pl.BlockSpec((tm, tn), lambda j, i: (i, j)),
            ),
            compiler_params=pltpu.CompilerParams(
                dimension_semantics=("parallel", "parallel"),
                vmem_limit_bytes=vmem_limit,
            ),
            cost_estimate=cost,
        )(x, w, b)
    else:
        # K-streamed fallback for very large K: f32 scratch accumulator,
        # single cast+store on the last K step, 3-deep weight pipeline.
        out = pl.pallas_call(
            _fc_kernel_ktiled,
            out_shape=jax.ShapeDtypeStruct((Mp, N), out_dtype),
            grid_spec=pltpu.PrefetchScalarGridSpec(
                num_scalar_prefetch=0,
                grid=(gn, gm, gk),
                in_specs=[
                    pl.BlockSpec((tm, tk), lambda j, i, k: (i, k)),   # x
                    pl.BlockSpec((tk, tn), lambda j, i, k: (k, j),
                                 pipeline_mode=pl.Buffered(3)),       # w
                    pl.BlockSpec((1, tn), lambda j, i, k: (0, j)),    # bias
                ],
                out_specs=pl.BlockSpec((tm, tn), lambda j, i, k: (i, j)),
                scratch_shapes=[pltpu.VMEM((tm, tn), jnp.float32)],
            ),
            compiler_params=pltpu.CompilerParams(
                dimension_semantics=("parallel", "parallel", "arbitrary"),
                vmem_limit_bytes=vmem_limit,
            ),
            cost_estimate=cost,
        )(x, w, b)

    if Mp != M:
        out = out[:M]
    return out


def make_params(key, num_bits=512, dtype=jnp.float32):
    """Deterministic init mimicking nn.Linear's U(-1/sqrt(in), 1/sqrt(in))."""
    kw, kb = jax.random.split(key)
    bound = 1.0 / jnp.sqrt(jnp.asarray(num_bits, jnp.float32))
    # PyTorch weight is (out, in); we store it transposed as (in, out).
    w = jax.random.uniform(kw, (num_bits, num_bits), dtype, -bound, bound)
    b = jax.random.uniform(kb, (1, num_bits), dtype, -bound, bound)
    return w, b


if __name__ == "__main__":
    num_bits = 512     # module default numBits=512
    batch = 8

    key = jax.random.PRNGKey(0)
    kx, kp = jax.random.split(key)
    x = jax.random.normal(kx, (batch, num_bits), jnp.float32)
    w, b = make_params(kp, num_bits)

    out = jax.block_until_ready(fc_forward(x, w, b))
    ref = x @ w + b
    assert out.shape == (batch, num_bits)
    assert jnp.allclose(out, ref, atol=1e-4, rtol=1e-4)

    # Exercise the batch-padding path (M not a sublane multiple).
    x5 = jax.random.normal(kx, (5, num_bits), jnp.float32)
    out5 = jax.block_until_ready(fc_forward(x5, w, b))
    assert out5.shape == (5, num_bits)
    assert jnp.allclose(out5, x5 @ w + b, atol=1e-4, rtol=1e-4)

    # TODO(synk): module's self.sigmoid is never applied in forward(); omitted.
    print("KERNEL_OK")
</pallas_src>

<mosaic_0001>
module attributes {stable_mosaic.version = 11 : i64} {
  func.func @_fc_kernel_fullk(%arg0: i32, %arg1: i32, %arg2: memref<8x512xf32, #tpu.memory_space<vmem>>, %arg3: memref<512x512xf32, #tpu.memory_space<vmem>>, %arg4: memref<1x512xf32, #tpu.memory_space<vmem>>, %arg5: memref<8x512xf32, #tpu.memory_space<vmem>>) attributes {dimension_semantics = [#tpu.dimension_semantics<parallel>, #tpu.dimension_semantics<parallel>], iteration_bounds = array<i64: 1, 1>, scalar_prefetch = 0 : i64, scratch_operands = 0 : i64, tpu.core_type = #tpu.core_type<tc>, window_params = [{transform_indices = @transform_0, window_bounds = array<i64: 8, 512>}, {transform_indices = @transform_1, window_bounds = array<i64: 512, 512>}, {transform_indices = @transform_2, window_bounds = array<i64: 1, 512>}, {transform_indices = @transform_3, window_bounds = array<i64: 8, 512>}]} {
    %c0 = arith.constant 0 : index
    %c0_0 = arith.constant 0 : index
    %0 = vector.load %arg2[%c0, %c0_0] : memref<8x512xf32, #tpu.memory_space<vmem>>, vector<8x512xf32>
    %c0_1 = arith.constant 0 : index
    %c0_2 = arith.constant 0 : index
    %1 = vector.load %arg3[%c0_1, %c0_2] : memref<512x512xf32, #tpu.memory_space<vmem>>, vector<512x512xf32>
    %cst = arith.constant dense<0.000000e+00> : vector<8x512xf32>
    %2 = tpu.matmul %0, %1, %cst {dimension_numbers = #tpu.dot_dimension_numbers<[1], [0], [0], [1], [0, 0, 1, 1], [], []>} : vector<8x512xf32>, vector<512x512xf32>, vector<8x512xf32> -> vector<8x512xf32>
    %c0_3 = arith.constant 0 : index
    %c0_4 = arith.constant 0 : index
    %3 = vector.load %arg4[%c0_3, %c0_4] : memref<1x512xf32, #tpu.memory_space<vmem>>, vector<1x512xf32>
    %4 = vector.broadcast %3 : vector<1x512xf32> to vector<8x512xf32>
    %5 = arith.addf %2, %4 : vector<8x512xf32>
    %c0_5 = arith.constant 0 : index
    %c0_6 = arith.constant 0 : index
    %6 = vector.load %arg5[%c0_5, %c0_6] : memref<8x512xf32, #tpu.memory_space<vmem>>, vector<8x512xf32>
    tpu.vector_store %arg5[%c0_5, %c0_6], %5 {strides = array<i32>} : memref<8x512xf32, #tpu.memory_space<vmem>>, vector<8x512xf32>,
    return
  }
  func.func @transform_0(%arg0: i32, %arg1: i32) -> (i32, i32) {
    %c0_i32 = arith.constant 0 : i32
    %c0_i32_0 = arith.constant 0 : i32
    return %arg1, %c0_i32 : i32, i32
  }
  func.func @transform_1(%arg0: i32, %arg1: i32) -> (i32, i32) {
    %c0_i32 = arith.constant 0 : i32
    %c0_i32_0 = arith.constant 0 : i32
    return %c0_i32, %arg0 : i32, i32
  }
  func.func @transform_2(%arg0: i32, %arg1: i32) -> (i32, i32) {
    %c0_i32 = arith.constant 0 : i32
    %c0_i32_0 = arith.constant 0 : i32
    return %c0_i32, %arg0 : i32, i32
  }
  func.func @transform_3(%arg0: i32, %arg1: i32) -> (i32, i32) {
    %c0_i32 = arith.constant 0 : i32
    return %arg1, %arg0 : i32, i32
  }
}

</mosaic_0001>

<bundles_post_ra>
// kernel: fc_forward.1
= control target key start
LH: loop header
LB: loop body
LE: loop exit
PB: predicated region body
PF: predicated region fallthrough
CT: control target
= control target key end

     0   :  { %8 = vsyncpa [#allocation3], 0  ;;  %s840_s0 = inlined_call_operand.hbm [shape: f32[8,512], index: 0, kind: input, shape index: {}]   ;;  %s841_s1 = inlined_call_operand.hbm [shape: f32[512,512], index: 1, kind: input, shape index: {}]   ;;  %s842_s2 = inlined_call_operand.hbm [shape: f32[1,512], index: 2, kind: input, shape index: {}]   ;;  %s843_s3 = inlined_call_operand.hbm [shape: f32[8,512], index: 3, kind: output, shape index: {}]  }
   0x1   :  { %9 = vsyncpa [#allocation6], 0  ;;  %s26_s14 = sshll.u32 %s841_s1, 4  ;;  %s27_s14 = int_to_ptr.hbm [resolvable:$true] %s26_s14 }
   0x2   :  { %10 = vsyncpa [#allocation4], 0  ;;  %s778_s15 = smov [#allocation5]   ;;  %s16_s19 = sshll.u32 %s840_s0, 4  ;;  %s17_s19 = int_to_ptr.hbm [resolvable:$true] %s16_s19 }
   0x3   :  { %s28_s16 = sshll.u32 %s778_s15, 4  ;;  %s779_s20 = smov 512   ;;  %s29_s16 = int_to_ptr.vmem [resolvable:$true] %s28_s16 }
   0x4   :  { %s780_s21 = smov 32   ;;  %s781_s22 = smov [#allocation2]  }
   0x5   :  { %34 = dma.hbm_to_vmem [thread:$0]  %s27_s14, 32768, %s29_s16, [#allocation6], %s779_s20, %s779_s20, %s780_s21  }
   0x6   :  { %s18_s23 = sshll.u32 %s781_s22, 4  ;;  %s40_s26 = sshll.u32 %s842_s2, 4  ;;  %s19_s23 = int_to_ptr.vmem [resolvable:$true] %s18_s23  ;;  %s41_s26 = int_to_ptr.hbm [resolvable:$true] %s40_s26 }
   0x7   :  { %21 = dma.hbm_to_vmem [thread:$0]  %s17_s19, 512, %s19_s23, [#allocation3]  }
   0x8   :  { %s782_s1 = smov [#allocation7]  }
   0x9   :  { %s42_s27 = sshll.u32 %s782_s1, 4  ;;  %s43_s27 = int_to_ptr.vmem [resolvable:$true] %s42_s27 }
   0xa   :  { %45 = dma.hbm_to_vmem [thread:$0]  %s41_s26, 64, %s43_s27, [#allocation6]  }
   0xb   :  { %772 = dma.done.wait [#allocation3], 512  }
   0xc   :  { %773 = vsyncadd [#allocation3], 4294966784 }
   0xd   :  { %774 = dma.done.wait [#allocation6], 32832  }
   0xe   :  { %775 = vsyncadd [#allocation6], 4294934464  ;;  %v250_v0 = vld [vmem:[#allocation5 + $0x5e0] sm:$0xff]  ;;  %v251_v62 = vld [vmem:[#allocation5 + $0x5e8] sm:$0xff]  ;;  %s783_s0 = smov [#allocation8]   ;;  %s659_s30 = sshll.u32 %s843_s3, 4  ;;  %s660_s30 = int_to_ptr.hbm [resolvable:$true] %s659_s30 }
   0xf   :  { %v122_v1 = vld [vmem:[#allocation5 + $0x1e0] sm:$0xff]  ;;  %368 = vmatpush.msra.mxu2 %v250_v0  ;;  %v123_v0 = vld [vmem:[#allocation5 + $0x1e8] sm:$0xff]  ;;  %s657_s2 = sshll.u32 %s783_s0, 4  ;;  %s658_s2 = int_to_ptr.vmem [resolvable:$true] %s657_s2 }
  0x10   :  { %v246_v2 = vld [vmem:[#allocation5 + $0x5c0] sm:$0xff]  ;;  %328 = vmatpush.msra.mxu0 %v122_v1  ;;  %v315_v1 = vld [vmem:[#allocation5 + $0x7e8] sm:$0xff] }
  0x11   :  { %v314_v3 = vld [vmem:[#allocation5 + $0x7e0] sm:$0xff]  ;;  %369 = vmatpush.msra.mxu2 %v246_v2  ;;  %v247_v2 = vld [vmem:[#allocation5 + $0x5c8] sm:$0xff] }
  0x12   :  { %v118_v4 = vld [vmem:[#allocation5 + $0x1c0] sm:$0xff]  ;;  %388 = vmatpush.msra.mxu3 %v314_v3 }
  0x13   :  { %v186_v5 = vld [vmem:[#allocation5 + $0x3e0] sm:$0xff]  ;;  %329 = vmatpush.msra.mxu0 %v118_v4  ;;  %v119_v4 = vld [vmem:[#allocation5 + $0x1c8] sm:$0xff] }
  0x14   :  { %348 = vmatpush.msra.mxu1 %v186_v5  ;;  %v242_v6 = vld [vmem:[#allocation5 + $0x5a0] sm:$0xff]  ;;  %v187_v5 = vld [vmem:[#allocation5 + $0x3e8] sm:$0xff] }
  0x15   :  { %v310_v7 = vld [vmem:[#allocation5 + $0x7c0] sm:$0xff]  ;;  %370 = vmatpush.msra.mxu2 %v242_v6  ;;  %v243_v6 = vld [vmem:[#allocation5 + $0x5a8] sm:$0xff] }
  0x16   :  { %v114_v8 = vld [vmem:[#allocation5 + $0x1a0] sm:$0xff]  ;;  %389 = vmatpush.msra.mxu3 %v310_v7  ;;  %v311_v7 = vld [vmem:[#allocation5 + $0x7c8] sm:$0xff] }
  0x17   :  { %v182_v9 = vld [vmem:[#allocation5 + $0x3c0] sm:$0xff]  ;;  %330 = vmatpush.msra.mxu0 %v114_v8  ;;  %v115_v8 = vld [vmem:[#allocation5 + $0x1a8] sm:$0xff] }
  0x18   :  { %v306_v10 = vld [vmem:[#allocation5 + $0x7a0] sm:$0xff]  ;;  %349 = vmatpush.msra.mxu1 %v182_v9  ;;  %v183_v9 = vld [vmem:[#allocation5 + $0x3c8] sm:$0xff] }
  0x19   :  { %v238_v11 = vld [vmem:[#allocation5 + $0x580] sm:$0xff]  ;;  %390 = vmatpush.msra.mxu3 %v306_v10  ;;  %v239_v10 = vld [vmem:[#allocation5 + $0x588] sm:$0xff] }
  0x1a   :  { %v110_v12 = vld [vmem:[#allocation5 + $0x180] sm:$0xff]  ;;  %371 = vmatpush.msra.mxu2 %v238_v11  ;;  %v307_v11 = vld [vmem:[#allocation5 + $0x7a8] sm:$0xff] }
  0x1b   :  { %v178_v13 = vld [vmem:[#allocation5 + $0x3a0] sm:$0xff]  ;;  %331 = vmatpush.msra.mxu0 %v110_v12  ;;  %v111_v12 = vld [vmem:[#allocation5 + $0x188] sm:$0xff] }
  0x1c   :  { %v302_v14 = vld [vmem:[#allocation5 + $0x780] sm:$0xff]  ;;  %350 = vmatpush.msra.mxu1 %v178_v13  ;;  %v179_v13 = vld [vmem:[#allocation5 + $0x3a8] sm:$0xff] }
  0x1d   :  { %v174_v15 = vld [vmem:[#allocation5 + $0x380] sm:$0xff]  ;;  %391 = vmatpush.msra.mxu3 %v302_v14  ;;  %v235_v14 = vld [vmem:[#allocation5 + $0x568] sm:$0xff] }
  0x1e   :  { %v234_v16 = vld [vmem:[#allocation5 + $0x560] sm:$0xff]  ;;  %351 = vmatpush.msra.mxu1 %v174_v15  ;;  %v303_v15 = vld [vmem:[#allocation5 + $0x788] sm:$0xff] }
  0x1f   :  { %v106_v17 = vld [vmem:[#allocation5 + $0x160] sm:$0xff]  ;;  %372 = vmatpush.msra.mxu2 %v234_v16  ;;  %v107_v16 = vld [vmem:[#allocation5 + $0x168] sm:$0xff] }
  0x20   :  { %v298_v18 = vld [vmem:[#allocation5 + $0x760] sm:$0xff]  ;;  %332 = vmatpush.msra.mxu0 %v106_v17  ;;  %v175_v17 = vld [vmem:[#allocation5 + $0x388] sm:$0xff] }
  0x21   :  { %v170_v19 = vld [vmem:[#allocation5 + $0x360] sm:$0xff]  ;;  %392 = vmatpush.msra.mxu3 %v298_v18  ;;  %v231_v18 = vld [vmem:[#allocation5 + $0x548] sm:$0xff] }
  0x22   :  { %v230_v20 = vld [vmem:[#allocation5 + $0x540] sm:$0xff]  ;;  %352 = vmatpush.msra.mxu1 %v170_v19  ;;  %v299_v19 = vld [vmem:[#allocation5 + $0x768] sm:$0xff] }
  0x23   :  { %v102_v21 = vld [vmem:[#allocation5 + $0x140] sm:$0xff]  ;;  %373 = vmatpush.msra.mxu2 %v230_v20  ;;  %v103_v20 = vld [vmem:[#allocation5 + $0x148] sm:$0xff] }
  0x24   :  { %v294_v22 = vld [vmem:[#allocation5 + $0x740] sm:$0xff]  ;;  %333 = vmatpush.msra.mxu0 %v102_v21  ;;  %v171_v21 = vld [vmem:[#allocation5 + $0x368] sm:$0xff] }
  0x25   :  { %v166_v23 = vld [vmem:[#allocation5 + $0x340] sm:$0xff]  ;;  %393 = vmatpush.msra.mxu3 %v294_v22  ;;  %v227_v22 = vld [vmem:[#allocation5 + $0x528] sm:$0xff] }
  0x26   :  { %v226_v24 = vld [vmem:[#allocation5 + $0x520] sm:$0xff]  ;;  %353 = vmatpush.msra.mxu1 %v166_v23  ;;  %v295_v23 = vld [vmem:[#allocation5 + $0x748] sm:$0xff] }
  0x27   :  { %v98_v25 = vld [vmem:[#allocation5 + $0x120] sm:$0xff]  ;;  %374 = vmatpush.msra.mxu2 %v226_v24  ;;  %v99_v24 = vld [vmem:[#allocation5 + $0x128] sm:$0xff] }
  0x28   :  { %v290_v26 = vld [vmem:[#allocation5 + $0x720] sm:$0xff]  ;;  %334 = vmatpush.msra.mxu0 %v98_v25  ;;  %v167_v25 = vld [vmem:[#allocation5 + $0x348] sm:$0xff] }
  0x29   :  { %v162_v27 = vld [vmem:[#allocation5 + $0x320] sm:$0xff]  ;;  %394 = vmatpush.msra.mxu3 %v290_v26  ;;  %v223_v26 = vld [vmem:[#allocation5 + $0x508] sm:$0xff] }
  0x2a   :  { %v222_v28 = vld [vmem:[#allocation5 + $0x500] sm:$0xff]  ;;  %354 = vmatpush.msra.mxu1 %v162_v27  ;;  %v291_v27 = vld [vmem:[#allocation5 + $0x728] sm:$0xff] }
  0x2b   :  { %v94_v29 = vld [vmem:[#allocation5 + $0x100] sm:$0xff]  ;;  %375 = vmatpush.msra.mxu2 %v222_v28  ;;  %v95_v28 = vld [vmem:[#allocation5 + $0x108] sm:$0xff] }
  0x2c   :  { %v286_v30 = vld [vmem:[#allocation5 + $0x700] sm:$0xff]  ;;  %335 = vmatpush.msra.mxu0 %v94_v29  ;;  %v163_v29 = vld [vmem:[#allocation5 + $0x328] sm:$0xff] }
  0x2d   :  { %v158_v31 = vld [vmem:[#allocation5 + $0x300] sm:$0xff]  ;;  %395 = vmatpush.msra.mxu3 %v286_v30  ;;  %v219_v30 = vld [vmem:[#allocation5 + $0x4e8] sm:$0xff] }
  0x2e   :  { %v218_v32 = vld [vmem:[#allocation5 + $0x4e0] sm:$0xff]  ;;  %355 = vmatpush.msra.mxu1 %v158_v31  ;;  %v287_v31 = vld [vmem:[#allocation5 + $0x708] sm:$0xff] }
  0x2f   :  { %v90_v33 = vld [vmem:[#allocation5 + $0xe0] sm:$0xff]  ;;  %376 = vmatpush.msra.mxu2 %v218_v32  ;;  %v91_v32 = vld [vmem:[#allocation5 + $0xe8] sm:$0xff] }
  0x30   :  { %v282_v34 = vld [vmem:[#allocation5 + $0x6e0] sm:$0xff]  ;;  %336 = vmatpush.msra.mxu0 %v90_v33  ;;  %v159_v33 = vld [vmem:[#allocation5 + $0x308] sm:$0xff] }
  0x31   :  { %v154_v35 = vld [vmem:[#allocation5 + $0x2e0] sm:$0xff]  ;;  %396 = vmatpush.msra.mxu3 %v282_v34  ;;  %v215_v34 = vld [vmem:[#allocation5 + $0x4c8] sm:$0xff] }
  0x32   :  { %v214_v36 = vld [vmem:[#allocation5 + $0x4c0] sm:$0xff]  ;;  %356 = vmatpush.msra.mxu1 %v154_v35  ;;  %v283_v35 = vld [vmem:[#allocation5 + $0x6e8] sm:$0xff] }
  0x33   :  { %v86_v37 = vld [vmem:[#allocation5 + $0xc0] sm:$0xff]  ;;  %377 = vmatpush.msra.mxu2 %v214_v36  ;;  %v87_v36 = vld [vmem:[#allocation5 + $0xc8] sm:$0xff] }
  0x34   :  { %v278_v38 = vld [vmem:[#allocation5 + $0x6c0] sm:$0xff]  ;;  %337 = vmatpush.msra.mxu0 %v86_v37  ;;  %v155_v37 = vld [vmem:[#allocation5 + $0x2e8] sm:$0xff] }
  0x35   :  { %v150_v39 = vld [vmem:[#allocation5 + $0x2c0] sm:$0xff]  ;;  %397 = vmatpush.msra.mxu3 %v278_v38  ;;  %v211_v38 = vld [vmem:[#allocation5 + $0x4a8] sm:$0xff] }
  0x36   :  { %v210_v40 = vld [vmem:[#allocation5 + $0x4a0] sm:$0xff]  ;;  %357 = vmatpush.msra.mxu1 %v150_v39  ;;  %v279_v39 = vld [vmem:[#allocation5 + $0x6c8] sm:$0xff] }
  0x37   :  { %v82_v41 = vld [vmem:[#allocation5 + $0xa0] sm:$0xff]  ;;  %378 = vmatpush.msra.mxu2 %v210_v40  ;;  %v83_v40 = vld [vmem:[#allocation5 + $0xa8] sm:$0xff] }
  0x38   :  { %v274_v42 = vld [vmem:[#allocation5 + $0x6a0] sm:$0xff]  ;;  %338 = vmatpush.msra.mxu0 %v82_v41  ;;  %v151_v41 = vld [vmem:[#allocation5 + $0x2c8] sm:$0xff] }
  0x39   :  { %v146_v43 = vld [vmem:[#allocation5 + $0x2a0] sm:$0xff]  ;;  %398 = vmatpush.msra.mxu3 %v274_v42  ;;  %v207_v42 = vld [vmem:[#allocation5 + $0x488] sm:$0xff] }
  0x3a   :  { %v206_v44 = vld [vmem:[#allocation5 + $0x480] sm:$0xff]  ;;  %358 = vmatpush.msra.mxu1 %v146_v43  ;;  %v275_v43 = vld [vmem:[#allocation5 + $0x6a8] sm:$0xff] }
  0x3b   :  { %v78_v45 = vld [vmem:[#allocation5 + $0x80] sm:$0xff]  ;;  %379 = vmatpush.msra.mxu2 %v206_v44  ;;  %v79_v44 = vld [vmem:[#allocation5 + $0x88] sm:$0xff] }
  0x3c   :  { %v270_v46 = vld [vmem:[#allocation5 + $0x680] sm:$0xff]  ;;  %339 = vmatpush.msra.mxu0 %v78_v45  ;;  %v147_v45 = vld [vmem:[#allocation5 + $0x2a8] sm:$0xff] }
  0x3d   :  { %v142_v47 = vld [vmem:[#allocation5 + $0x280] sm:$0xff]  ;;  %399 = vmatpush.msra.mxu3 %v270_v46  ;;  %v203_v46 = vld [vmem:[#allocation5 + $0x468] sm:$0xff] }
  0x3e   :  { %v202_v48 = vld [vmem:[#allocation5 + $0x460] sm:$0xff]  ;;  %359 = vmatpush.msra.mxu1 %v142_v47  ;;  %v271_v47 = vld [vmem:[#allocation5 + $0x688] sm:$0xff] }
  0x3f   :  { %v74_v49 = vld [vmem:[#allocation5 + $0x60] sm:$0xff]  ;;  %380 = vmatpush.msra.mxu2 %v202_v48  ;;  %v75_v48 = vld [vmem:[#allocation5 + $0x68] sm:$0xff] }
  0x40   :  { %v266_v50 = vld [vmem:[#allocation5 + $0x660] sm:$0xff]  ;;  %340 = vmatpush.msra.mxu0 %v74_v49  ;;  %v143_v49 = vld [vmem:[#allocation5 + $0x288] sm:$0xff] }
  0x41   :  { %v138_v51 = vld [vmem:[#allocation5 + $0x260] sm:$0xff]  ;;  %400 = vmatpush.msra.mxu3 %v266_v50  ;;  %v199_v50 = vld [vmem:[#allocation5 + $0x448] sm:$0xff] }
  0x42   :  { %v198_v52 = vld [vmem:[#allocation5 + $0x440] sm:$0xff]  ;;  %360 = vmatpush.msra.mxu1 %v138_v51  ;;  %v267_v51 = vld [vmem:[#allocation5 + $0x668] sm:$0xff] }
  0x43   :  { %v70_v53 = vld [vmem:[#allocation5 + $0x40] sm:$0xff]  ;;  %381 = vmatpush.msra.mxu2 %v198_v52  ;;  %v71_v52 = vld [vmem:[#allocation5 + $0x48] sm:$0xff] }
  0x44   :  { %v262_v54 = vld [vmem:[#allocation5 + $0x640] sm:$0xff]  ;;  %341 = vmatpush.msra.mxu0 %v70_v53  ;;  %v139_v53 = vld [vmem:[#allocation5 + $0x268] sm:$0xff] }
  0x45   :  { %v134_v55 = vld [vmem:[#allocation5 + $0x240] sm:$0xff]  ;;  %401 = vmatpush.msra.mxu3 %v262_v54  ;;  %v195_v54 = vld [vmem:[#allocation5 + $0x428] sm:$0xff] }
  0x46   :  { %v194_v56 = vld [vmem:[#allocation5 + $0x420] sm:$0xff]  ;;  %361 = vmatpush.msra.mxu1 %v134_v55  ;;  %v263_v55 = vld [vmem:[#allocation5 + $0x648] sm:$0xff] }
  0x47   :  { %v66_v57 = vld [vmem:[#allocation5 + $0x20] sm:$0xff]  ;;  %382 = vmatpush.msra.mxu2 %v194_v56  ;;  %v67_v56 = vld [vmem:[#allocation5 + $0x28] sm:$0xff] }
  0x48   :  { %v258_v58 = vld [vmem:[#allocation5 + $0x620] sm:$0xff]  ;;  %342 = vmatpush.msra.mxu0 %v66_v57  ;;  %v135_v57 = vld [vmem:[#allocation5 + $0x248] sm:$0xff] }
  0x49   :  { %v130_v59 = vld [vmem:[#allocation5 + $0x220] sm:$0xff]  ;;  %402 = vmatpush.msra.mxu3 %v258_v58  ;;  %v191_v58 = vld [vmem:[#allocation5 + $0x408] sm:$0xff] }
  0x4a   :  { %v190_v60 = vld [vmem:[#allocation5 + $0x400] sm:$0xff]  ;;  %362 = vmatpush.msra.mxu1 %v130_v59  ;;  %v259_v59 = vld [vmem:[#allocation5 + $0x628] sm:$0xff] }
  0x4b   :  { %v62_v61 = vld [vmem:[#allocation5] sm:$0xff]  ;;  %383 = vmatpush.msra.mxu2 %v190_v60  ;;  %v813_v60 = vld [vmem:[#allocation2 + $0x10] sm:$0xff] }
  0x4c   :  { %v254_v63 = vld [vmem:[#allocation5 + $0x600] sm:$0xff]  ;;  %343 = vmatpush.msra.mxu0 %v62_v61  ;;  %v63_v61 = vld [vmem:[#allocation5 + $0x8] sm:$0xff]  ;;  %384 = vmatmul.f32.vlgmr.msra.gmra.mxu2 %v813_v60 }
  0x4d   :  { %v126_v3 = vld [vmem:[#allocation5 + $0x200] sm:$0xff]  ;;  %448 = vmatpush.msrb.mxu2 %v251_v62  ;;  %403 = vmatpush.msra.mxu3 %v254_v63  ;;  %v252_v62 = vld [vmem:[#allocation5 + $0x5f0] sm:$0xff]  ;;  %v131_v63 = vld [vmem:[#allocation5 + $0x228] sm:$0xff] }
  0x4e   :  { %408 = vmatpush.msrb.mxu0 %v123_v0  ;;  %363 = vmatpush.msra.mxu1 %v126_v3  ;;  %v255_v0 = vld [vmem:[#allocation5 + $0x608] sm:$0xff]  ;;  %v124_v3 = vld [vmem:[#allocation5 + $0x1f0] sm:$0xff] }
  0x4f   :  { %468 = vmatpush.msrb.mxu3 %v315_v1  ;;  %449 = vmatpush.msrb.mxu2 %v247_v2  ;;  %v815_v1 = vld [vmem:[#allocation2] sm:$0xff]  ;;  %v818_v2 = vld [vmem:[#allocation2 + $0x18] sm:$0xff] }
  0x50   :  { %409 = vmatpush.msrb.mxu0 %v119_v4  ;;  %428 = vmatpush.msrb.mxu1 %v187_v5  ;;  %v248_v4 = vld [vmem:[#allocation5 + $0x5d0] sm:$0xff] }
  0x51   :  { %450 = vmatpush.msrb.mxu2 %v243_v6  ;;  %469 = vmatpush.msrb.mxu3 %v311_v7  ;;  %v316_v5 = vld [vmem:[#allocation5 + $0x7f0] sm:$0xff]  ;;  %v127_v6 = vld [vmem:[#allocation5 + $0x208] sm:$0xff] }
  0x52   :  { %410 = vmatpush.msrb.mxu0 %v115_v8  ;;  %429 = vmatpush.msrb.mxu1 %v183_v9  ;;  %v120_v7 = vld [vmem:[#allocation5 + $0x1d0] sm:$0xff]  ;;  %v822_v8 = vld [vmem:[#allocation2 + $0x8] sm:$0xff] }
  0x53   :  { %451 = vmatpush.msrb.mxu2 %v239_v10  ;;  %470 = vmatpush.msrb.mxu3 %v307_v11  ;;  %v244_v9 = vld [vmem:[#allocation5 + $0x5b0] sm:$0xff] }
  0x54   :  { %411 = vmatpush.msrb.mxu0 %v111_v12  ;;  %430 = vmatpush.msrb.mxu1 %v179_v13  ;;  %v188_v10 = vld [vmem:[#allocation5 + $0x3f0] sm:$0xff] }
  0x55   :  { %452 = vmatpush.msrb.mxu2 %v235_v14  ;;  %471 = vmatpush.msrb.mxu3 %v303_v15  ;;  %v312_v11 = vld [vmem:[#allocation5 + $0x7d0] sm:$0xff] }
  0x56   :  { %412 = vmatpush.msrb.mxu0 %v107_v16  ;;  %431 = vmatpush.msrb.mxu1 %v175_v17  ;;  %v116_v12 = vld [vmem:[#allocation5 + $0x1b0] sm:$0xff] }
  0x57   :  { %453 = vmatpush.msrb.mxu2 %v231_v18  ;;  %472 = vmatpush.msrb.mxu3 %v299_v19  ;;  %v240_v13 = vld [vmem:[#allocation5 + $0x590] sm:$0xff] }
  0x58   :  { %413 = vmatpush.msrb.mxu0 %v103_v20  ;;  %432 = vmatpush.msrb.mxu1 %v171_v21  ;;  %v184_v14 = vld [vmem:[#allocation5 + $0x3d0] sm:$0xff] }
  0x59   :  { %454 = vmatpush.msrb.mxu2 %v227_v22  ;;  %473 = vmatpush.msrb.mxu3 %v295_v23  ;;  %v308_v15 = vld [vmem:[#allocation5 + $0x7b0] sm:$0xff] }
  0x5a   :  { %414 = vmatpush.msrb.mxu0 %v99_v24  ;;  %433 = vmatpush.msrb.mxu1 %v167_v25  ;;  %v112_v16 = vld [vmem:[#allocation5 + $0x190] sm:$0xff] }
  0x5b   :  { %455 = vmatpush.msrb.mxu2 %v223_v26  ;;  %474 = vmatpush.msrb.mxu3 %v291_v27  ;;  %v236_v17 = vld [vmem:[#allocation5 + $0x570] sm:$0xff] }
  0x5c   :  { %415 = vmatpush.msrb.mxu0 %v95_v28  ;;  %434 = vmatpush.msrb.mxu1 %v163_v29  ;;  %v180_v18 = vld [vmem:[#allocation5 + $0x3b0] sm:$0xff] }
  0x5d   :  { %456 = vmatpush.msrb.mxu2 %v219_v30  ;;  %475 = vmatpush.msrb.mxu3 %v287_v31  ;;  %v304_v19 = vld [vmem:[#allocation5 + $0x790] sm:$0xff] }
  0x5e   :  { %416 = vmatpush.msrb.mxu0 %v91_v32  ;;  %435 = vmatpush.msrb.mxu1 %v159_v33  ;;  %v108_v20 = vld [vmem:[#allocation5 + $0x170] sm:$0xff] }
  0x5f   :  { %457 = vmatpush.msrb.mxu2 %v215_v34  ;;  %476 = vmatpush.msrb.mxu3 %v283_v35  ;;  %v232_v21 = vld [vmem:[#allocation5 + $0x550] sm:$0xff] }
  0x60   :  { %417 = vmatpush.msrb.mxu0 %v87_v36  ;;  %436 = vmatpush.msrb.mxu1 %v155_v37  ;;  %v176_v22 = vld [vmem:[#allocation5 + $0x390] sm:$0xff] }
  0x61   :  { %458 = vmatpush.msrb.mxu2 %v211_v38  ;;  %477 = vmatpush.msrb.mxu3 %v279_v39  ;;  %v300_v23 = vld [vmem:[#allocation5 + $0x770] sm:$0xff] }
  0x62   :  { %418 = vmatpush.msrb.mxu0 %v83_v40  ;;  %437 = vmatpush.msrb.mxu1 %v151_v41  ;;  %v104_v24 = vld [vmem:[#allocation5 + $0x150] sm:$0xff] }
  0x63   :  { %459 = vmatpush.msrb.mxu2 %v207_v42  ;;  %478 = vmatpush.msrb.mxu3 %v275_v43  ;;  %v228_v25 = vld [vmem:[#allocation5 + $0x530] sm:$0xff] }
  0x64   :  { %419 = vmatpush.msrb.mxu0 %v79_v44  ;;  %438 = vmatpush.msrb.mxu1 %v147_v45  ;;  %v172_v26 = vld [vmem:[#allocation5 + $0x370] sm:$0xff] }
  0x65   :  { %460 = vmatpush.msrb.mxu2 %v203_v46  ;;  %479 = vmatpush.msrb.mxu3 %v271_v47  ;;  %v296_v27 = vld [vmem:[#allocation5 + $0x750] sm:$0xff] }
  0x66   :  { %420 = vmatpush.msrb.mxu0 %v75_v48  ;;  %439 = vmatpush.msrb.mxu1 %v143_v49  ;;  %v100_v28 = vld [vmem:[#allocation5 + $0x130] sm:$0xff] }
  0x67   :  { %461 = vmatpush.msrb.mxu2 %v199_v50  ;;  %480 = vmatpush.msrb.mxu3 %v267_v51  ;;  %v224_v29 = vld [vmem:[#allocation5 + $0x510] sm:$0xff] }
  0x68   :  { %421 = vmatpush.msrb.mxu0 %v71_v52  ;;  %440 = vmatpush.msrb.mxu1 %v139_v53  ;;  %v168_v30 = vld [vmem:[#allocation5 + $0x350] sm:$0xff] }
  0x69   :  { %462 = vmatpush.msrb.mxu2 %v195_v54  ;;  %481 = vmatpush.msrb.mxu3 %v263_v55  ;;  %v292_v31 = vld [vmem:[#allocation5 + $0x730] sm:$0xff] }
  0x6a   :  { %422 = vmatpush.msrb.mxu0 %v67_v56  ;;  %441 = vmatpush.msrb.mxu1 %v135_v57  ;;  %v96_v32 = vld [vmem:[#allocation5 + $0x110] sm:$0xff] }
  0x6b   :  { %463 = vmatpush.msrb.mxu2 %v191_v58  ;;  %482 = vmatpush.msrb.mxu3 %v259_v59  ;;  %v220_v33 = vld [vmem:[#allocation5 + $0x4f0] sm:$0xff] }
  0x6c   :  { %423 = vmatpush.msrb.mxu0 %v63_v61  ;;  %442 = vmatpush.msrb.mxu1 %v131_v63  ;;  %v164_v34 = vld [vmem:[#allocation5 + $0x330] sm:$0xff] }
  0x6d   :  { %528 = vmatpush.msra.mxu2 %v252_v62  ;;  %483 = vmatpush.msrb.mxu3 %v255_v0  ;;  %v288_v35 = vld [vmem:[#allocation5 + $0x710] sm:$0xff] }
  0x6e   :  { %344 = vmatmul.f32.vlgmr.msra.gmra.mxu0 %v815_v1  ;;  %404 = vmatmul.f32.vlgmr.msra.gmra.mxu3 %v818_v2  ;;  %v92_v36 = vld [vmem:[#allocation5 + $0xf0] sm:$0xff] }
  0x6f   :  { %488 = vmatpush.msra.mxu0 %v124_v3  ;;  %529 = vmatpush.msra.mxu2 %v248_v4  ;;  %v216_v37 = vld [vmem:[#allocation5 + $0x4d0] sm:$0xff]  ;;  %v253_v4 = vld [vmem:[#allocation5 + $0x5f8] sm:$0xff] }
  0x70   :  { %548 = vmatpush.msra.mxu3 %v316_v5  ;;  %443 = vmatpush.msrb.mxu1 %v127_v6  ;;  %v160_v38 = vld [vmem:[#allocation5 + $0x310] sm:$0xff] }
  0x71   :  { %489 = vmatpush.msra.mxu0 %v120_v7  ;;  %364 = vmatmul.f32.vlgmr.msra.gmra.mxu1 %v822_v8  ;;  %v284_v39 = vld [vmem:[#allocation5 + $0x6f0] sm:$0xff]  ;;  %v125_v7 = vld [vmem:[#allocation5 + $0x1f8] sm:$0xff] }
  0x72   :  { %530 = vmatpush.msra.mxu2 %v244_v9  ;;  %508 = vmatpush.msra.mxu1 %v188_v10  ;;  %v88_v40 = vld [vmem:[#allocation5 + $0xd0] sm:$0xff]  ;;  %v249_v9 = vld [vmem:[#allocation5 + $0x5d8] sm:$0xff] }
  0x73   :  { %549 = vmatpush.msra.mxu3 %v312_v11  ;;  %490 = vmatpush.msra.mxu0 %v116_v12  ;;  %v212_v41 = vld [vmem:[#allocation5 + $0x4b0] sm:$0xff]  ;;  %v317_v10 = vld [vmem:[#allocation5 + $0x7f8] sm:$0xff] }
  0x74   :  { %531 = vmatpush.msra.mxu2 %v240_v13  ;;  %509 = vmatpush.msra.mxu1 %v184_v14  ;;  %v156_v42 = vld [vmem:[#allocation5 + $0x2f0] sm:$0xff]  ;;  %v121_v12 = vld [vmem:[#allocation5 + $0x1d8] sm:$0xff] }
  0x75   :  { %550 = vmatpush.msra.mxu3 %v308_v15  ;;  %491 = vmatpush.msra.mxu0 %v112_v16  ;;  %v280_v43 = vld [vmem:[#allocation5 + $0x6d0] sm:$0xff]  ;;  %v245_v13 = vld [vmem:[#allocation5 + $0x5b8] sm:$0xff] }
  0x76   :  { %532 = vmatpush.msra.mxu2 %v236_v17  ;;  %510 = vmatpush.msra.mxu1 %v180_v18  ;;  %v84_v44 = vld [vmem:[#allocation5 + $0xb0] sm:$0xff]  ;;  %v189_v14 = vld [vmem:[#allocation5 + $0x3f8] sm:$0xff] }
  0x77   :  { %551 = vmatpush.msra.mxu3 %v304_v19  ;;  %492 = vmatpush.msra.mxu0 %v108_v20  ;;  %v208_v45 = vld [vmem:[#allocation5 + $0x490] sm:$0xff]  ;;  %v313_v15 = vld [vmem:[#allocation5 + $0x7d8] sm:$0xff] }
  0x78   :  { %533 = vmatpush.msra.mxu2 %v232_v21  ;;  %511 = vmatpush.msra.mxu1 %v176_v22  ;;  %v152_v46 = vld [vmem:[#allocation5 + $0x2d0] sm:$0xff]  ;;  %v117_v16 = vld [vmem:[#allocation5 + $0x1b8] sm:$0xff] }
  0x79   :  { %552 = vmatpush.msra.mxu3 %v300_v23  ;;  %493 = vmatpush.msra.mxu0 %v104_v24  ;;  %v276_v47 = vld [vmem:[#allocation5 + $0x6b0] sm:$0xff]  ;;  %v241_v17 = vld [vmem:[#allocation5 + $0x598] sm:$0xff] }
  0x7a   :  { %534 = vmatpush.msra.mxu2 %v228_v25  ;;  %512 = vmatpush.msra.mxu1 %v172_v26  ;;  %v80_v48 = vld [vmem:[#allocation5 + $0x90] sm:$0xff]  ;;  %v185_v18 = vld [vmem:[#allocation5 + $0x3d8] sm:$0xff] }
  0x7b   :  { %553 = vmatpush.msra.mxu3 %v296_v27  ;;  %494 = vmatpush.msra.mxu0 %v100_v28  ;;  %v204_v49 = vld [vmem:[#allocation5 + $0x470] sm:$0xff]  ;;  %v309_v19 = vld [vmem:[#allocation5 + $0x7b8] sm:$0xff] }
  0x7c   :  { %535 = vmatpush.msra.mxu2 %v224_v29  ;;  %513 = vmatpush.msra.mxu1 %v168_v30  ;;  %v148_v50 = vld [vmem:[#allocation5 + $0x2b0] sm:$0xff]  ;;  %v113_v20 = vld [vmem:[#allocation5 + $0x198] sm:$0xff] }
  0x7d   :  { %554 = vmatpush.msra.mxu3 %v292_v31  ;;  %495 = vmatpush.msra.mxu0 %v96_v32  ;;  %v272_v51 = vld [vmem:[#allocation5 + $0x690] sm:$0xff]  ;;  %v237_v21 = vld [vmem:[#allocation5 + $0x578] sm:$0xff] }
  0x7e   :  { %536 = vmatpush.msra.mxu2 %v220_v33  ;;  %514 = vmatpush.msra.mxu1 %v164_v34  ;;  %v76_v52 = vld [vmem:[#allocation5 + $0x70] sm:$0xff]  ;;  %v181_v22 = vld [vmem:[#allocation5 + $0x3b8] sm:$0xff] }
  0x7f   :  { %555 = vmatpush.msra.mxu3 %v288_v35  ;;  %496 = vmatpush.msra.mxu0 %v92_v36  ;;  %v200_v53 = vld [vmem:[#allocation5 + $0x450] sm:$0xff]  ;;  %v305_v23 = vld [vmem:[#allocation5 + $0x798] sm:$0xff] }
  0x80   :  { %537 = vmatpush.msra.mxu2 %v216_v37  ;;  %515 = vmatpush.msra.mxu1 %v160_v38  ;;  %v144_v54 = vld [vmem:[#allocation5 + $0x290] sm:$0xff]  ;;  %v109_v24 = vld [vmem:[#allocation5 + $0x178] sm:$0xff] }
  0x81   :  { %556 = vmatpush.msra.mxu3 %v284_v39  ;;  %497 = vmatpush.msra.mxu0 %v88_v40  ;;  %v268_v55 = vld [vmem:[#allocation5 + $0x670] sm:$0xff]  ;;  %v233_v25 = vld [vmem:[#allocation5 + $0x558] sm:$0xff] }
  0x82   :  { %538 = vmatpush.msra.mxu2 %v212_v41  ;;  %516 = vmatpush.msra.mxu1 %v156_v42  ;;  %v72_v56 = vld [vmem:[#allocation5 + $0x50] sm:$0xff]  ;;  %v177_v26 = vld [vmem:[#allocation5 + $0x398] sm:$0xff] }
  0x83   :  { %557 = vmatpush.msra.mxu3 %v280_v43  ;;  %498 = vmatpush.msra.mxu0 %v84_v44  ;;  %v196_v57 = vld [vmem:[#allocation5 + $0x430] sm:$0xff]  ;;  %v301_v27 = vld [vmem:[#allocation5 + $0x778] sm:$0xff] }
  0x84   :  { %539 = vmatpush.msra.mxu2 %v208_v45  ;;  %517 = vmatpush.msra.mxu1 %v152_v46  ;;  %v140_v58 = vld [vmem:[#allocation5 + $0x270] sm:$0xff]  ;;  %v105_v28 = vld [vmem:[#allocation5 + $0x158] sm:$0xff] }
  0x85   :  { %558 = vmatpush.msra.mxu3 %v276_v47  ;;  %499 = vmatpush.msra.mxu0 %v80_v48  ;;  %v264_v59 = vld [vmem:[#allocation5 + $0x650] sm:$0xff]  ;;  %v229_v29 = vld [vmem:[#allocation5 + $0x538] sm:$0xff] }
  0x86   :  { %540 = vmatpush.msra.mxu2 %v204_v49  ;;  %518 = vmatpush.msra.mxu1 %v148_v50  ;;  %v68_v61 = vld [vmem:[#allocation5 + $0x30] sm:$0xff]  ;;  %v173_v30 = vld [vmem:[#allocation5 + $0x378] sm:$0xff] }
  0x87   :  { %559 = vmatpush.msra.mxu3 %v272_v51  ;;  %500 = vmatpush.msra.mxu0 %v76_v52  ;;  %v192_v62 = vld [vmem:[#allocation5 + $0x410] sm:$0xff]  ;;  %v297_v31 = vld [vmem:[#allocation5 + $0x758] sm:$0xff] }
  0x88   :  { %541 = vmatpush.msra.mxu2 %v200_v53  ;;  %519 = vmatpush.msra.mxu1 %v144_v54  ;;  %v136_v63 = vld [vmem:[#allocation5 + $0x250] sm:$0xff]  ;;  %v101_v32 = vld [vmem:[#allocation5 + $0x138] sm:$0xff] }
  0x89   :  { %560 = vmatpush.msra.mxu3 %v268_v55  ;;  %501 = vmatpush.msra.mxu0 %v72_v56  ;;  %v260_v0 = vld [vmem:[#allocation5 + $0x630] sm:$0xff]  ;;  %v225_v33 = vld [vmem:[#allocation5 + $0x518] sm:$0xff] }
  0x8a   :  { %542 = vmatpush.msra.mxu2 %v196_v57  ;;  %520 = vmatpush.msra.mxu1 %v140_v58  ;;  %v64_v3 = vld [vmem:[#allocation5 + $0x10] sm:$0xff]  ;;  %v169_v34 = vld [vmem:[#allocation5 + $0x358] sm:$0xff] }
  0x8b   :  { %561 = vmatpush.msra.mxu3 %v264_v59  ;;  %502 = vmatpush.msra.mxu0 %v68_v61  ;;  %v132_v5 = vld [vmem:[#allocation5 + $0x230] sm:$0xff]  ;;  %v293_v35 = vld [vmem:[#allocation5 + $0x738] sm:$0xff] }
  0x8c   :  { %543 = vmatpush.msra.mxu2 %v192_v62  ;;  %521 = vmatpush.msra.mxu1 %v136_v63  ;;  %v256_v6 = vld [vmem:[#allocation5 + $0x610] sm:$0xff]  ;;  %v97_v36 = vld [vmem:[#allocation5 + $0x118] sm:$0xff] }
  0x8d   :  { %562 = vmatpush.msra.mxu3 %v260_v0  ;;  %464 = vmatmul.f32.vlgmr.msrb.gmra.mxu2 %v813_v60  ;;  %v128_v11 = vld [vmem:[#allocation5 + $0x210] sm:$0xff]  ;;  %v221_v37 = vld [vmem:[#allocation5 + $0x4f8] sm:$0xff] }
  0x8e   :  { %503 = vmatpush.msra.mxu0 %v64_v3  ;;  %608 = vmatpush.msrb.mxu2 %v253_v4  ;;  %v165_v38 = vld [vmem:[#allocation5 + $0x338] sm:$0xff] }
  0x8f   :  { %522 = vmatpush.msra.mxu1 %v132_v5  ;;  %563 = vmatpush.msra.mxu3 %v256_v6  ;;  %v289_v39 = vld [vmem:[#allocation5 + $0x718] sm:$0xff] }
  0x90   :  { %424 = vmatmul.f32.vlgmr.msrb.gmra.mxu0 %v815_v1  ;;  %484 = vmatmul.f32.vlgmr.msrb.gmra.mxu3 %v818_v2  ;;  %v93_v40 = vld [vmem:[#allocation5 + $0xf8] sm:$0xff] }
  0x91   :  { %568 = vmatpush.msrb.mxu0 %v125_v7  ;;  %609 = vmatpush.msrb.mxu2 %v249_v9  ;;  %v217_v41 = vld [vmem:[#allocation5 + $0x4d8] sm:$0xff] }
  0x92   :  { %628 = vmatpush.msrb.mxu3 %v317_v10  ;;  %523 = vmatpush.msra.mxu1 %v128_v11  ;;  %v161_v42 = vld [vmem:[#allocation5 + $0x318] sm:$0xff] }
  0x93   :  { %569 = vmatpush.msrb.mxu0 %v121_v12  ;;  %444 = vmatmul.f32.vlgmr.msrb.gmra.mxu1 %v822_v8  ;;  %v285_v43 = vld [vmem:[#allocation5 + $0x6f8] sm:$0xff]  ;;  %v318_v12 = vld [vmem:[#allocation7] sm:$0xf] }
  0x94   :  { %610 = vmatpush.msrb.mxu2 %v245_v13  ;;  %588 = vmatpush.msrb.mxu1 %v189_v14  ;;  %v89_v44 = vld [vmem:[#allocation5 + $0xd8] sm:$0xff]  ;;  %v320_v13 = vperm.slane %v318_v12, 0 }
  0x95   :  { %629 = vmatpush.msrb.mxu3 %v313_v15  ;;  %570 = vmatpush.msrb.mxu0 %v117_v16  ;;  %v213_v45 = vld [vmem:[#allocation5 + $0x4b8] sm:$0xff] }
  0x96   :  { %611 = vmatpush.msrb.mxu2 %v241_v17  ;;  %589 = vmatpush.msrb.mxu1 %v185_v18  ;;  %v157_v46 = vld [vmem:[#allocation5 + $0x2f8] sm:$0xff] }
  0x97   :  { %630 = vmatpush.msrb.mxu3 %v309_v19  ;;  %571 = vmatpush.msrb.mxu0 %v113_v20  ;;  %v281_v47 = vld [vmem:[#allocation5 + $0x6d8] sm:$0xff] }
  0x98   :  { %612 = vmatpush.msrb.mxu2 %v237_v21  ;;  %590 = vmatpush.msrb.mxu1 %v181_v22  ;;  %v85_v48 = vld [vmem:[#allocation5 + $0xb8] sm:$0xff]  ;;  %v321_v21 = vperm.slane %v318_v12, 1 }
  0x99   :  { %631 = vmatpush.msrb.mxu3 %v305_v23  ;;  %572 = vmatpush.msrb.mxu0 %v109_v24  ;;  %v209_v49 = vld [vmem:[#allocation5 + $0x498] sm:$0xff] }
  0x9a   :  { %613 = vmatpush.msrb.mxu2 %v233_v25  ;;  %591 = vmatpush.msrb.mxu1 %v177_v26  ;;  %v153_v50 = vld [vmem:[#allocation5 + $0x2d8] sm:$0xff] }
  0x9b   :  { %632 = vmatpush.msrb.mxu3 %v301_v27  ;;  %573 = vmatpush.msrb.mxu0 %v105_v28  ;;  %v277_v51 = vld [vmem:[#allocation5 + $0x6b8] sm:$0xff]  ;;  %v322_v27 = vperm.slane %v318_v12, 2 }
  0x9c   :  { %614 = vmatpush.msrb.mxu2 %v229_v29  ;;  %592 = vmatpush.msrb.mxu1 %v173_v30  ;;  %v81_v52 = vld [vmem:[#allocation5 + $0x98] sm:$0xff] }
  0x9d   :  { %633 = vmatpush.msrb.mxu3 %v297_v31  ;;  %574 = vmatpush.msrb.mxu0 %v101_v32  ;;  %v149_v53 = vld [vmem:[#allocation5 + $0x2b8] sm:$0xff] }
  0x9e   :  { %615 = vmatpush.msrb.mxu2 %v225_v33  ;;  %593 = vmatpush.msrb.mxu1 %v169_v34  ;;  %v205_v54 = vld [vmem:[#allocation5 + $0x478] sm:$0xff] }
  0x9f   :  { %634 = vmatpush.msrb.mxu3 %v293_v35  ;;  %575 = vmatpush.msrb.mxu0 %v97_v36  ;;  %v273_v55 = vld [vmem:[#allocation5 + $0x698] sm:$0xff]  ;;  %v323_v35 = vperm.slane %v318_v12, 3 }
  0xa0   :  { %616 = vmatpush.msrb.mxu2 %v221_v37  ;;  %594 = vmatpush.msrb.mxu1 %v165_v38  ;;  %v77_v56 = vld [vmem:[#allocation5 + $0x78] sm:$0xff] }
  0xa1   :  { %635 = vmatpush.msrb.mxu3 %v289_v39  ;;  %576 = vmatpush.msrb.mxu0 %v93_v40  ;;  %v145_v57 = vld [vmem:[#allocation5 + $0x298] sm:$0xff] }
  0xa2   :  { %617 = vmatpush.msrb.mxu2 %v217_v41  ;;  %595 = vmatpush.msrb.mxu1 %v161_v42  ;;  %v201_v58 = vld [vmem:[#allocation5 + $0x458] sm:$0xff] }
  0xa3   :  { %636 = vmatpush.msrb.mxu3 %v285_v43  ;;  %577 = vmatpush.msrb.mxu0 %v89_v44  ;;  %v269_v59 = vld [vmem:[#allocation5 + $0x678] sm:$0xff] }
  0xa4   :  { %618 = vmatpush.msrb.mxu2 %v213_v45  ;;  %596 = vmatpush.msrb.mxu1 %v157_v46  ;;  %v73_v61 = vld [vmem:[#allocation5 + $0x58] sm:$0xff] }
  0xa5   :  { %637 = vmatpush.msrb.mxu3 %v281_v47  ;;  %578 = vmatpush.msrb.mxu0 %v85_v48  ;;  %v141_v62 = vld [vmem:[#allocation5 + $0x278] sm:$0xff] }
  0xa6   :  { %619 = vmatpush.msrb.mxu2 %v209_v49  ;;  %597 = vmatpush.msrb.mxu1 %v153_v50  ;;  %v197_v63 = vld [vmem:[#allocation5 + $0x438] sm:$0xff] }
  0xa7   :  { %638 = vmatpush.msrb.mxu3 %v277_v51  ;;  %544 = vmatmul.f32.vlgmr.msra.gmra.mxu2 %v813_v60  ;;  %v265_v0 = vld [vmem:[#allocation5 + $0x658] sm:$0xff] }
  0xa8   :  { %579 = vmatpush.msrb.mxu0 %v81_v52  ;;  %598 = vmatpush.msrb.mxu1 %v149_v53  ;;  %v69_v3 = vld [vmem:[#allocation5 + $0x38] sm:$0xff] }
  0xa9   :  { %620 = vmatpush.msrb.mxu2 %v205_v54  ;;  %639 = vmatpush.msrb.mxu3 %v273_v55  ;;  %v137_v4 = vld [vmem:[#allocation5 + $0x258] sm:$0xff] }
  0xaa   :  { %504 = vmatmul.f32.vlgmr.msra.gmra.mxu0 %v815_v1  ;;  %564 = vmatmul.f32.vlgmr.msra.gmra.mxu3 %v818_v2  ;;  %v193_v5 = vld [vmem:[#allocation5 + $0x418] sm:$0xff] }
  0xab   :  { %580 = vmatpush.msrb.mxu0 %v77_v56  ;;  %599 = vmatpush.msrb.mxu1 %v145_v57  ;;  %v261_v6 = vld [vmem:[#allocation5 + $0x638] sm:$0xff] }
  0xac   :  { %621 = vmatpush.msrb.mxu2 %v201_v58  ;;  %640 = vmatpush.msrb.mxu3 %v269_v59  ;;  %v65_v7 = vld [vmem:[#allocation5 + $0x18] sm:$0xff] }
  0xad   :  { %524 = vmatmul.f32.vlgmr.msra.gmra.mxu1 %v822_v8  ;;  %581 = vmatpush.msrb.mxu0 %v73_v61  ;;  %v133_v9 = vld [vmem:[#allocation5 + $0x238] sm:$0xff] }
  0xae   :  { %600 = vmatpush.msrb.mxu1 %v141_v62  ;;  %622 = vmatpush.msrb.mxu2 %v197_v63  ;;  %v257_v10 = vld [vmem:[#allocation5 + $0x618] sm:$0xff] }
  0xaf   :  { %641 = vmatpush.msrb.mxu3 %v265_v0  ;;  %582 = vmatpush.msrb.mxu0 %v69_v3  ;;  %v129_v11 = vld [vmem:[#allocation5 + $0x218] sm:$0xff] }
  0xb0   :  { %601 = vmatpush.msrb.mxu1 %v137_v4  ;;  %623 = vmatpush.msrb.mxu2 %v193_v5 }
  0xb1   :  { %642 = vmatpush.msrb.mxu3 %v261_v6  ;;  %624 = vmatmul.f32.vlgmr.msrb.gmra.mxu2 %v813_v60 }
  0xb2   :  { %583 = vmatpush.msrb.mxu0 %v65_v7  ;;  %602 = vmatpush.msrb.mxu1 %v133_v9 }
  0xb3   :  { %643 = vmatpush.msrb.mxu3 %v257_v10  ;;  %584 = vmatmul.f32.vlgmr.msrb.gmra.mxu0 %v815_v1 }
  0xb4   :  { %644 = vmatmul.f32.vlgmr.msrb.gmra.mxu3 %v818_v2  ;;  %603 = vmatpush.msrb.mxu1 %v129_v11 }
  0xb5   :  { %604 = vmatmul.f32.vlgmr.msrb.gmra.mxu1 %v822_v8 }
  0xcf   :  { %v385_v17 = vpop.f32.mrf.mxu2 }
  0xeb   :  { %v345_v14 = vpop.f32.mrf.mxu0 }
  0xec   :  { %v346_v15 = vadd.f32 %v345_v14, %v320_v13 }
  0xee   :  { %v365_v16 = vpop.f32.mrf.mxu1 }
  0xef   :  { %v366_v18 = vadd.f32 %v365_v16, %v346_v15 }
  0xf1   :  { %v386_v19 = vadd.f32 %v385_v17, %v366_v18  ;;  %v405_v60 = vpop.f32.mrf.mxu3 }
  0xf3   :  { %v406_v20 = vadd.f32 %v405_v60, %v386_v19 }
  0xf5   :  { %648 = vst [vmem:[#allocation8] sm:$0xff] %v406_v20 }
 0x10d   :  { %v425_v22 = vpop.f32.mrf.mxu0 }
 0x10e   :  { %v426_v23 = vadd.f32 %v425_v22, %v321_v21 }
 0x110   :  { %v445_v1 = vpop.f32.mrf.mxu1  ;;  %v465_v24 = vpop.f32.mrf.mxu2 }
 0x111   :  { %v446_v2 = vadd.f32 %v445_v1, %v426_v23 }
 0x113   :  { %v466_v25 = vadd.f32 %v465_v24, %v446_v2  ;;  %v485_v26 = vpop.f32.mrf.mxu3 }
 0x115   :  { %v486_v8 = vadd.f32 %v485_v26, %v466_v25 }
 0x117   :  { %649 = vst [vmem:[#allocation8 + $0x8] sm:$0xff] %v486_v8 }
 0x127   :  { %v505_v28 = vpop.f32.mrf.mxu0 }
 0x128   :  { %v506_v29 = vadd.f32 %v505_v28, %v322_v27 }
 0x12a   :  { %v525_v30 = vpop.f32.mrf.mxu1  ;;  %v545_v32 = vpop.f32.mrf.mxu2 }
 0x12b   :  { %v526_v31 = vadd.f32 %v525_v30, %v506_v29 }
 0x12d   :  { %v546_v33 = vadd.f32 %v545_v32, %v526_v31  ;;  %v565_v34 = vpop.f32.mrf.mxu3 }
 0x12f   :  { %v566_v36 = vadd.f32 %v565_v34, %v546_v33 }
 0x130   :  { %v585_v37 = vpop.f32.mrf.mxu0 }
 0x131   :  { %650 = vst [vmem:[#allocation8 + $0x10] sm:$0xff] %v566_v36  ;;  %v586_v38 = vadd.f32 %v585_v37, %v323_v35 }
 0x132   :  { %v605_v39 = vpop.f32.mrf.mxu1 }
 0x133   :  { %v606_v40 = vadd.f32 %v605_v39, %v586_v38 }
 0x134   :  { %v625_v41 = vpop.f32.mrf.mxu2 }
 0x135   :  { %v626_v42 = vadd.f32 %v625_v41, %v606_v40 }
 0x137   :  { %v645_v43 = vpop.f32.mrf.mxu3 }
 0x138   :  { %v646_v44 = vadd.f32 %v645_v43, %v626_v42 }
 0x13a   :  { %651 = vst [vmem:[#allocation8 + $0x18] sm:$0xff] %v646_v44 }
 0x13b   :  { %662 = dma.vmem_to_hbm [thread:$0]  %s658_s2, 512, %s660_s30, [#allocation4]  }
 0x13c   :  { %776 = dma.done.wait [#allocation4], 512  }
 0x13d   :  { %777 = vsyncadd [#allocation4], 4294966784 }
 0x13e   :  { %667 = vsyncpa [#allocation3], 1 }
 0x13f   :  { %668 = vsyncpa [#allocation6], 1 }
 0x140   :  { %669 = vsyncpa [#allocation4], 1 }

</bundles_post_ra>
